<compile_context>
chip_gen: v7x
topology: tpu7x:2x2x1
jax: 0.10.0
libtpu: 0.0.40
codegen_flags: <defaults>
</compile_context>

<pallas_src>
import functools

import jax
import jax.numpy as jnp
from jax.experimental import pallas as pl
from jax.experimental.pallas import tpu as pltpu


def mlp_kernel(xT_ref, w1_ref, b1_ref, w2_ref, b2_ref, w3c_ref, b3_ref, o_ref,
               *, use_bf16_l2):
    xT = xT_ref[...]                                     # (3, TB), batch on lanes

    # ---- Layer 1: K=3 contraction on the MXU (Mosaic pads K; MXU has slack) ----
    h = jnp.dot(w1_ref[...], xT, preferred_element_type=jnp.float32) + b1_ref[...]
    h = jnp.maximum(h, 0.0)                              # (64, TB)

    # ---- Layer 2: 64x64 matmul on the MXU, lane-dense N=TB output ----
    if use_bf16_l2:
        # v6e/v7x: native bf16 MXU, f32 accumulate.
        h = jnp.dot(w2_ref[...].astype(jnp.bfloat16), h.astype(jnp.bfloat16),
                    preferred_element_type=jnp.float32) + b2_ref[...]
    else:
        # v5e (or unknown): bit-faithful f32 path.
        h = jnp.dot(w2_ref[...], h, preferred_element_type=jnp.float32) + b2_ref[...]
    h = jnp.maximum(h, 0.0)                              # (64, TB)

    # ---- Layer 3: N=1 output via VPU multiply + sublane (XLU) reduce, not MXU ----
    y = jnp.sum(h * w3c_ref[...], axis=0, keepdims=True) + b3_ref[...]   # (1, TB)
    o_ref[...] = y.astype(o_ref.dtype)


def _round_up(n, m):
    return (n + m - 1) // m * m


def _mxu_prefers_bf16():
    """bf16 MXU inputs on v6e / v7x; keep f32 on v5e / unknown."""
    try:
        kind = jax.devices()[0].device_kind.lower()
    except Exception:
        return False
    return any(t in kind for t in ("v6", "v7", "7x", "trillium"))


def mlp_forward(x, w1, b1, w2, b2, w3, b3, *, tb=4096, use_bf16_l2=None):
    """Forward pass of the 3->64->64->1 MLP.

    x:  (B, 3) float32
    w1: (64, 3), b1: (64,)   -- PyTorch nn.Linear layout (out_features, in_features)
    w2: (64, 64), b2: (64,)
    w3: (1, 64),  b3: (1,)
    Returns (B, 1).
    """
    B, F = x.shape
    H = w1.shape[0]
    if use_bf16_l2 is None:
        use_bf16_l2 = _mxu_prefers_bf16()

    # ---- Tile selection: big lane-dense tiles, but keep >=2 grid steps (v7x megacore).
    tb = _round_up(max(tb, 128), 128)
    b128 = _round_up(max(B, 1), 128)
    TB = min(tb, b128)
    if b128 >= 2 * 128 and b128 <= TB:
        TB = _round_up(b128 // 2, 128)
    B_pad = _round_up(B, TB)

    # ---- Single fused pad+transpose (no zeros + scatter double pass over x). ----
    # With allow_input_fusion XLA may pull this producer into the pallas input DMA.
    xT = jnp.pad(x, ((0, B_pad - B), (0, 0))).T          # (F, B_pad)

    # Column-shaped params broadcast along lanes inside the kernel (done once here).
    b1c = b1.reshape(H, 1)
    b2c = b2.reshape(H, 1)
    w3c = w3.reshape(H, 1)                               # (1, 64) -> (64, 1)
    b3c = b3.reshape(1, 1)

    whole = lambda a: pl.BlockSpec(a.shape, lambda i: (0,) * a.ndim)

    # Only matters if tb is pushed very large (v5e's scoped-VMEM default is 16 MiB).
    vmem_limit = None
    est_vmem = 4 * H * TB * 4 + 4 * (F + 1) * TB * 4
    if est_vmem > 12 * (1 << 20):
        vmem_limit = min(est_vmem + (4 << 20), 64 << 20)

    n_in = 7
    yT = pl.pallas_call(
        functools.partial(mlp_kernel, use_bf16_l2=use_bf16_l2),
        out_shape=jax.ShapeDtypeStruct((1, B_pad), x.dtype),
        grid=(B_pad // TB,),
        in_specs=[
            pl.BlockSpec((F, TB), lambda i: (0, i)),     # x^T tile, lane-dense
            whole(w1), whole(b1c),
            whole(w2), whole(b2c),
            whole(w3c), whole(b3c),
        ],
        out_specs=pl.BlockSpec((1, TB), lambda i: (0, i)),   # lane-dense store
        compiler_params=pltpu.CompilerParams(
            dimension_semantics=("parallel",),           # megacore on v7x
            allow_input_fusion=[True] + [False] * (n_in - 1),
            vmem_limit_bytes=vmem_limit,
        ),
    )(xT, w1, b1c, w2, b2c, w3c, b3c)

    # (1, B_pad) row -> (B, 1); reshape of a single row is free (same flat order).
    return yT[0, :B].reshape(B, 1)


def init_params(key):
    # Mimic nn.Linear default init: uniform in ±1/sqrt(fan_in), PyTorch (out, in) layout.
    k1, k2, k3, k4, k5, k6 = jax.random.split(key, 6)

    def lin(kw, kb, fan_in, fan_out):
        bound = 1.0 / jnp.sqrt(fan_in)
        w = jax.random.uniform(kw, (fan_out, fan_in), jnp.float32, -bound, bound)
        b = jax.random.uniform(kb, (fan_out,), jnp.float32, -bound, bound)
        return w, b

    w1, b1 = lin(k1, k2, 3, 64)
    w2, b2 = lin(k3, k4, 64, 64)
    w3, b3 = lin(k5, k6, 64, 1)
    return w1, b1, w2, b2, w3, b3


if __name__ == "__main__":
    key = jax.random.PRNGKey(0)
    kx, kp = jax.random.split(key)

    # Small demo batch; the TB clamp still yields a 2-step "parallel" grid (128 lanes/step).
    B = 256
    x = jax.random.normal(kx, (B, 3), dtype=jnp.float32)
    params = init_params(kp)

    use_bf16 = _mxu_prefers_bf16()
    out = mlp_forward(x, *params, use_bf16_l2=use_bf16)
    jax.block_until_ready(out)

    # Reference check in plain JAX (PyTorch semantics: y = x @ W^T + b).
    w1, b1, w2, b2, w3, b3 = params
    h = jnp.maximum(x @ w1.T + b1, 0.0)
    h = jnp.maximum(h @ w2.T + b2, 0.0)
    ref = h @ w3.T + b3

    assert out.shape == (B, 1)
    tol = 5e-2 if use_bf16 else 1e-5    # bf16 layer-2 path (v6e/v7x) relaxes tolerance
    err = float(jnp.max(jnp.abs(out - ref)))
    assert jnp.allclose(out, ref, atol=tol, rtol=tol), err

    print("KERNEL_OK")
</pallas_src>

<mosaic_0001>
module attributes {stable_mosaic.version = 11 : i64} {
  func.func @mlp_kernel(%arg0: i32, %arg1: memref<3x128xf32, #tpu.memory_space<vmem>>, %arg2: memref<64x3xf32, #tpu.memory_space<vmem>>, %arg3: memref<64x1xf32, #tpu.memory_space<vmem>>, %arg4: memref<64x64xf32, #tpu.memory_space<vmem>>, %arg5: memref<64x1xf32, #tpu.memory_space<vmem>>, %arg6: memref<64x1xf32, #tpu.memory_space<vmem>>, %arg7: memref<1x1xf32, #tpu.memory_space<vmem>>, %arg8: memref<1x128xf32, #tpu.memory_space<vmem>>) attributes {dimension_semantics = [#tpu.dimension_semantics<parallel>], iteration_bounds = array<i64: 2>, scalar_prefetch = 0 : i64, scratch_operands = 0 : i64, tpu.core_type = #tpu.core_type<tc>, window_params = [{transform_indices = @transform_0, window_bounds = array<i64: 3, 128>}, {pipeline_mode = #tpu.pipeline_mode<synchronous>, transform_indices = @transform_1, window_bounds = array<i64: 64, 3>}, {pipeline_mode = #tpu.pipeline_mode<synchronous>, transform_indices = @transform_2, window_bounds = array<i64: 64, 1>}, {pipeline_mode = #tpu.pipeline_mode<synchronous>, transform_indices = @transform_3, window_bounds = array<i64: 64, 64>}, {pipeline_mode = #tpu.pipeline_mode<synchronous>, transform_indices = @transform_4, window_bounds = array<i64: 64, 1>}, {pipeline_mode = #tpu.pipeline_mode<synchronous>, transform_indices = @transform_5, window_bounds = array<i64: 64, 1>}, {pipeline_mode = #tpu.pipeline_mode<synchronous>, transform_indices = @transform_6, window_bounds = array<i64: 1, 1>}, {transform_indices = @transform_7, window_bounds = array<i64: 1, 128>}]} {
    %c0 = arith.constant 0 : index
    %c0_0 = arith.constant 0 : index
    %0 = vector.load %arg1[%c0, %c0_0] : memref<3x128xf32, #tpu.memory_space<vmem>>, vector<3x128xf32>
    %c0_1 = arith.constant 0 : index
    %c0_2 = arith.constant 0 : index
    %1 = vector.load %arg2[%c0_1, %c0_2] : memref<64x3xf32, #tpu.memory_space<vmem>>, vector<64x3xf32>
    %cst = arith.constant dense<0.000000e+00> : vector<64x128xf32>
    %2 = tpu.matmul %1, %0, %cst {dimension_numbers = #tpu.dot_dimension_numbers<[1], [0], [0], [1], [0, 0, 1, 1], [], []>} : vector<64x3xf32>, vector<3x128xf32>, vector<64x128xf32> -> vector<64x128xf32>
    %c0_3 = arith.constant 0 : index
    %c0_4 = arith.constant 0 : index
    %3 = vector.load %arg3[%c0_3, %c0_4] : memref<64x1xf32, #tpu.memory_space<vmem>>, vector<64x1xf32>
    %4 = vector.broadcast %3 : vector<64x1xf32> to vector<64x128xf32>
    %5 = arith.addf %2, %4 : vector<64x128xf32>
    %cst_5 = arith.constant 0.000000e+00 : f32
    %6 = vector.broadcast %cst_5 : f32 to vector<64x128xf32>
    %7 = arith.maximumf %5, %6 : vector<64x128xf32>
    %c0_6 = arith.constant 0 : index
    %c0_7 = arith.constant 0 : index
    %8 = vector.load %arg4[%c0_6, %c0_7] : memref<64x64xf32, #tpu.memory_space<vmem>>, vector<64x64xf32>
    %cst_8 = arith.constant dense<0.000000e+00> : vector<64x128xf32>
    %9 = tpu.matmul %8, %7, %cst_8 {dimension_numbers = #tpu.dot_dimension_numbers<[1], [0], [0], [1], [0, 0, 1, 1], [], []>} : vector<64x64xf32>, vector<64x128xf32>, vector<64x128xf32> -> vector<64x128xf32>
    %c0_9 = arith.constant 0 : index
    %c0_10 = arith.constant 0 : index
    %10 = vector.load %arg5[%c0_9, %c0_10] : memref<64x1xf32, #tpu.memory_space<vmem>>, vector<64x1xf32>
    %11 = vector.broadcast %10 : vector<64x1xf32> to vector<64x128xf32>
    %12 = arith.addf %9, %11 : vector<64x128xf32>
    %cst_11 = arith.constant 0.000000e+00 : f32
    %13 = vector.broadcast %cst_11 : f32 to vector<64x128xf32>
    %14 = arith.maximumf %12, %13 : vector<64x128xf32>
    %c0_12 = arith.constant 0 : index
    %c0_13 = arith.constant 0 : index
    %15 = vector.load %arg6[%c0_12, %c0_13] : memref<64x1xf32, #tpu.memory_space<vmem>>, vector<64x1xf32>
    %16 = vector.broadcast %15 : vector<64x1xf32> to vector<64x128xf32>
    %17 = arith.mulf %14, %16 : vector<64x128xf32>
    %cst_14 = arith.constant dense<0.000000e+00> : vector<128xf32>
    %18 = vector.multi_reduction <add>, %17, %cst_14 [0] : vector<64x128xf32> to vector<128xf32>
    %19 = vector.shape_cast %18 : vector<128xf32> to vector<1x128xf32>
    %c0_15 = arith.constant 0 : index
    %c0_16 = arith.constant 0 : index
    %20 = vector.load %arg7[%c0_15, %c0_16] : memref<1x1xf32, #tpu.memory_space<vmem>>, vector<1x1xf32>
    %21 = vector.broadcast %20 : vector<1x1xf32> to vector<1x128xf32>
    %22 = arith.addf %19, %21 : vector<1x128xf32>
    %c0_17 = arith.constant 0 : index
    %c0_18 = arith.constant 0 : index
    %23 = vector.load %arg8[%c0_17, %c0_18] : memref<1x128xf32, #tpu.memory_space<vmem>>, vector<1x128xf32>
    tpu.vector_store %arg8[%c0_17, %c0_18], %22 {strides = array<i32>} : memref<1x128xf32, #tpu.memory_space<vmem>>, vector<1x128xf32>,
    return
  }
  func.func @transform_0(%arg0: i32) -> (i32, i32) {
    %c0_i32 = arith.constant 0 : i32
    %c0_i32_0 = arith.constant 0 : i32
    return %c0_i32, %arg0 : i32, i32
  }
  func.func @transform_1(%arg0: i32) -> (i32, i32) {
    %c0_i32 = arith.constant 0 : i32
    %c0_i32_0 = arith.constant 0 : i32
    %c0_i32_1 = arith.constant 0 : i32
    return %c0_i32, %c0_i32_0 : i32, i32
  }
  func.func @transform_2(%arg0: i32) -> (i32, i32) {
    %c0_i32 = arith.constant 0 : i32
    %c0_i32_0 = arith.constant 0 : i32
    %c0_i32_1 = arith.constant 0 : i32
    return %c0_i32, %c0_i32_0 : i32, i32
  }
  func.func @transform_3(%arg0: i32) -> (i32, i32) {
    %c0_i32 = arith.constant 0 : i32
    %c0_i32_0 = arith.constant 0 : i32
    %c0_i32_1 = arith.constant 0 : i32
    return %c0_i32, %c0_i32_0 : i32, i32
  }
  func.func @transform_4(%arg0: i32) -> (i32, i32) {
    %c0_i32 = arith.constant 0 : i32
    %c0_i32_0 = arith.constant 0 : i32
    %c0_i32_1 = arith.constant 0 : i32
    return %c0_i32, %c0_i32_0 : i32, i32
  }
  func.func @transform_5(%arg0: i32) -> (i32, i32) {
    %c0_i32 = arith.constant 0 : i32
    %c0_i32_0 = arith.constant 0 : i32
    %c0_i32_1 = arith.constant 0 : i32
    return %c0_i32, %c0_i32_0 : i32, i32
  }
  func.func @transform_6(%arg0: i32) -> (i32, i32) {
    %c0_i32 = arith.constant 0 : i32
    %c0_i32_0 = arith.constant 0 : i32
    %c0_i32_1 = arith.constant 0 : i32
    return %c0_i32, %c0_i32_0 : i32, i32
  }
  func.func @transform_7(%arg0: i32) -> (i32, i32) {
    %c0_i32 = arith.constant 0 : i32
    %c0_i32_0 = arith.constant 0 : i32
    return %c0_i32, %arg0 : i32, i32
  }
}

</mosaic_0001>

<bundles_post_ra>
// kernel: tpu_custom_call.1
= control target key start
LH: loop header
LB: loop body
LE: loop exit
PB: predicated region body
PF: predicated region fallthrough
CT: control target
= control target key end

     0   :  { %s1320_s0 = inlined_call_operand.vmem [shape: f32[3,256], index: 0, kind: input, shape index: {}]   ;;  %s1321_s1 = inlined_call_operand.vmem [shape: f32[64,3], index: 1, kind: input, shape index: {}]   ;;  %s1322_s2 = inlined_call_operand.vmem [shape: f32[64,1], index: 2, kind: input, shape index: {}]   ;;  %s1323_s3 = inlined_call_operand.vmem [shape: f32[64,64], index: 3, kind: input, shape index: {}]   ;;  %s1324_s4 = inlined_call_operand.vmem [shape: f32[64,1], index: 4, kind: input, shape index: {}]   ;;  %s1325_s5 = inlined_call_operand.vmem [shape: f32[64,1], index: 5, kind: input, shape index: {}]   ;;  %s1326_s6 = inlined_call_operand.<no memory space> [shape: f32[1,1], index: 6, kind: input, shape index: {}]   ;;  %s1327_s7 = inlined_call_operand.hbm [shape: f32[1,256], index: 7, kind: output, shape index: {}]  }
   0x1   :  { %v12_v0 = vstv %s1326_s6 }
   0x2   :  { %13 = vst [vmem:[#allocation2] sm:$0x1] %v12_v0 }
   0x3   :  { %14 = vsyncpa [#allocation4], 0 }
   0x4   :  { %16 = vsyncpa [#allocation4 + $0x1], 0  ;;  %s1084_s26 = smov 0   ;;  %s1086_s27 = smov 0  }
   0x5   :  { %s1088_s28 = smov 0   ;;  %s1090_s29 = smov 0  }
   0x6 LB: > { %s1105_s6 = sadd.s32 4294967295, %s1037_s29   ;;  %s817_s30 = sadd.s32 4294967294, %s1037_s29   ;;  %s1037_s29 = sphi %s1090_s29, %s1333_s29   ;;  %s1033_s28 = sphi %s1088_s28, %s1332_s28   ;;  %s1029_s27 = sphi %s1086_s27, %s1331_s27   ;;  %s1025_s26 = sphi %s1084_s26, %s1330_s26  }
   0x7   : > { %s1109_s8 = sadd.s32 1, %s1037_s29   ;;  %s181_s9 = sadd.s32 1, %s1033_s28 }
   0x8   : > { %s178_s10 = ssub.s32 %s1037_s29, %s1109_s8  ;;  %p191_p0 = scmp.ne.s32.totalorder %s1033_s28, %s1029_s27 }
   0x9   : > { %p179_p1 = scmp.eq.s32.totalorder %s178_s10, 0  ;;  %p192_p2 = scmp.eq.s32.totalorder %s1105_s6, 1 }
   0xa   : > { %p197_p3 = scmp.ne.s32.totalorder %s1029_s27, %s1025_s26  ;;  %p198_p4 = scmp.eq.s32.totalorder %s817_s30, 1 }
   0xb   : > { %s1120_s11 = scalar_select %p179_p1, %s1033_s28, %s181_s9  }
   0xc   : > { %p1122_p5 = por %p192_p2, %p191_p0  ;;  %p1126_p6 = por %p198_p4, %p197_p3 }
   0xd   : > { %p820_p7 = scmp.ge.s32.totalorder %s1037_s29, 1  ;;  %p241_p8 = scmp.lt.s32.totalorder %s1037_s29, 3 }
   0xf   : > { %p242_p9 = pnand %p820_p7, %p241_p8 }
  0x10   : > { %p271_p10 = scmp.lt.s32.totalorder (!%p242_p9), %s1105_s6, 1  ;;  %v276_v1 = vld [vmem:[%s1321_s1] sm:$0xff] (!%p242_p9)  ;;  %vm332_vm0 = vcmask (!%p242_p9), 23552   ;;  %v1039_v2 = vmov (!%p242_p9), 0   ;;  %v286_v4 = vld [vmem:[%s1322_s2 + $0x10] sm:$0xff] (!%p242_p9)  ;;  %vm357_vm1 = vcmask (!%p242_p9), 1042432  }
  0x11   : > { %245 = sbr.rel (%p242_p9) target bundleno = 527 (0x20f), region = 48  ;;  %869 = vmatprep.mubr.msk.f32.mxu0 (!%p242_p9), %vm332_vm0, %v276_v1  ;;  %973 = vset.pattern.permute.xlu0 (!%p242_p9), %v1039_v2  ;;  %v284_v3 = vld [vmem:[%s1322_s2] sm:$0xff] (!%p242_p9)  ;;  %v285_v5 = vld [vmem:[%s1322_s2 + $0x8] sm:$0xff] (!%p242_p9)  ;;  %v287_v6 = vld [vmem:[%s1322_s2 + $0x18] sm:$0xff] (!%p242_p9)  ;;  %vm530_vm2 = vcmask (!%p242_p9), 523264   ;;  %s269_s24 = sand.u32 (!%p242_p9), 1, %s1029_s27  }
  0x12   : > { %974 = vset.pattern.permute.xlu1 (!%p242_p9), %v1039_v2  ;;  %294 = vperm.xlu0 (!%p242_p9), %973, %v284_v3   ;;  %v277_v8 = vld [vmem:[%s1321_s1 + $0x8] sm:$0xff] (!%p242_p9)  ;;  %v278_v9 = vld [vmem:[%s1321_s1 + $0x10] sm:$0xff] (!%p242_p9)  ;;  %v288_v10 = vld [vmem:[%s1322_s2 + $0x20] sm:$0xff] (!%p242_p9)  ;;  %s839_s25 = sshll.u32 (!%p242_p9), %s1105_s6, 4 }
  0x13   : > { %304 = vperm.xlu1 (!%p242_p9), %974, %v286_v4   ;;  %v289_v11 = vld [vmem:[%s1322_s2 + $0x28] sm:$0xff] (!%p242_p9)  ;;  %v279_v12 = vld [vmem:[%s1321_s1 + $0x18] sm:$0xff] (!%p242_p9)  ;;  %v280_v13 = vld [vmem:[%s1321_s1 + $0x20] sm:$0xff] (!%p242_p9)  ;;  %s1278_s15 = scalar_lea.hbm (!%p242_p9), %s1327_s7, %s839_s25 }
  0x14   : > { %v290_v14 = vld [vmem:[%s1322_s2 + $0x30] sm:$0xff] (!%p242_p9)  ;;  %v291_v15 = vld [vmem:[%s1322_s2 + $0x38] sm:$0xff] (!%p242_p9)  ;;  %v281_v16 = vld [vmem:[%s1321_s1 + $0x28] sm:$0xff] (!%p242_p9) }
  0x15   : > { %v282_v17 = vld [vmem:[%s1321_s1 + $0x30] sm:$0xff] (!%p242_p9)  ;;  %v482_v18 = vld [vmem:[%s1324_s4] sm:$0xff] (!%p242_p9)  ;;  %v483_v19 = vld [vmem:[%s1324_s4 + $0x8] sm:$0xff] (!%p242_p9) }
  0x16   : > { %299 = vperm.xlu0 (!%p242_p9), %973, %v285_v5   ;;  %v283_v20 = vld [vmem:[%s1321_s1 + $0x38] sm:$0xff] (!%p242_p9)  ;;  %v484_v21 = vld [vmem:[%s1324_s4 + $0x10] sm:$0xff] (!%p242_p9)  ;;  %v668_v23 = vld [vmem:[%s1325_s5] sm:$0xff] (!%p242_p9) }
  0x17   : > { %309 = vperm.xlu1 (!%p242_p9), %974, %v287_v6   ;;  %v485_v22 = vld [vmem:[%s1324_s4 + $0x18] sm:$0xff] (!%p242_p9)  ;;  %v669_v24 = vld [vmem:[%s1325_s5 + $0x8] sm:$0xff] (!%p242_p9)  ;;  %v486_v25 = vld [vmem:[%s1324_s4 + $0x20] sm:$0xff] (!%p242_p9) }
  0x18   : > { %s272_s16 = scalar_select %p271_p10, %s1105_s6, 1  ;;  %v670_v26 = vld [vmem:[%s1325_s5 + $0x10] sm:$0xff]  ;;  %v487_v27 = vld [vmem:[%s1324_s4 + $0x28] sm:$0xff]  ;;  %v671_v28 = vld [vmem:[%s1325_s5 + $0x18] sm:$0xff] }
  0x19   : > { %v488_v29 = vld [vmem:[%s1324_s4 + $0x30] sm:$0xff]  ;;  %v672_v30 = vld [vmem:[%s1325_s5 + $0x20] sm:$0xff]  ;;  %v489_v31 = vld [vmem:[%s1324_s4 + $0x38] sm:$0xff]  ;;  %s1040_s6 = smov [#allocation3]  }
  0x1a   : > { %s821_s21 = sshll.u32 %s272_s16, 2  ;;  %314 = vperm.xlu0 %973, %v288_v10   ;;  %v673_v32 = vld [vmem:[%s1325_s5 + $0x28] sm:$0xff]  ;;  %v674_v33 = vld [vmem:[%s1325_s5 + $0x30] sm:$0xff]  ;;  %v675_v34 = vld [vmem:[%s1325_s5 + $0x38] sm:$0xff]  ;;  %s750_s16 = scalar_lea.sflag [#allocation4], %s269_s24 }
  0x1b   : > { %s274_s30 = scalar_lea.vmem %s1320_s0, %s821_s21  ;;  %319 = vperm.xlu1 %974, %v289_v11   ;;  %v737_v35 = vld [vmem:[#allocation2] sm:$0x1]  ;;  %v476_v37 = vld [vmem:[%s1323_s3 + $0x10] sm:$0xff]  ;;  %v475_v10 = vld [vmem:[%s1323_s3 + $0x8] sm:$0xff]  ;;  %s979_s18 = sshll.u32 %s1040_s6, 4  ;;  %s980_s18 = int_to_ptr.vmem [resolvable:$false] %s979_s18 }
  0x1c   : > { %v275_v7 = vld [vmem:[%s274_s30] sm:$0x7]  ;;  %900 = vmatprep.mubr.msk.f32.mxu1 %vm530_vm2, %v476_v37  ;;  %v477_v11 = vld [vmem:[%s1323_s3 + $0x18] sm:$0xff]  ;;  %s270_s30 = scalar_lea.vmem [#allocation3], %s269_s24  ;;  %s981_s19 = scalar_lea.vmem %s980_s18, 32 }
  0x1d   : > { %867 = vmatprep.subr.msk.mxu0 %vm357_vm1, %v275_v7  ;;  %v474_v36 = vld [vmem:[%s1323_s3] sm:$0xff]  ;;  %s762_s9 = sshll.u32 %s270_s30, 4  ;;  %s1280_s9 = int_to_ptr.vmem [resolvable:$true] %s762_s9 }
  0x1e   : > { %868 = vmatpush3.msk.msra.mxu0 %vm357_vm1, %v275_v7  ;;  %324 = vperm.xlu0 %973, %v290_v14   ;;  %v480_v14 = vld [vmem:[%s1323_s3 + $0x30] sm:$0xff]  ;;  %s975_s17 = scalar_lea.vmem %s1280_s9, 16  ;;  %p982_p0 = scmp.lt.s32.totalorder %s1280_s9, %s980_s18 }
  0x1f   : > { %870 = vmatmul.mubr.msk.f32.vlgmr.msra.gmra.mrb[0].mxu0 %vm332_vm0, %v277_v8  ;;  %329 = vperm.xlu1 %974, %v291_v15   ;;  %v481_v15 = vld [vmem:[%s1323_s3 + $0x38] sm:$0xff]  ;;  %p976_p11 = scmp.ne.s32.totalorder %s1280_s9, %s975_s17  ;;  %p983_p1 = scmp.lt.s32.totalorder %s981_s19, %s975_s17 }
  0x20   : > { %872 = vmatprep.mubr.msk.f32.mxu0 %vm332_vm0, %v278_v9 }
  0x21   : > { %p977_p12 = pnand %p976_p11, %p1122_p5  ;;  %p984_p2 = por %p983_p1, %p982_p0 }
  0x22   : > { %492 = vperm.xlu0 %973, %v482_v18  }
  0x23   : > { %873 = vmatmul.mubr.msk.f32.gmra.mrb[2].mxu0 %vm332_vm0, %v279_v12  ;;  %497 = vperm.xlu1 %974, %v483_v19   ;;  %v478_v12 = vld [vmem:[%s1323_s3 + $0x20] sm:$0xff]  ;;  %p978_p13 = pneg %p977_p12 }
  0x24   : > { %875 = vmatprep.mubr.msk.f32.mxu0 %vm332_vm0, %v280_v13  ;;  %v479_v13 = vld [vmem:[%s1323_s3 + $0x28] sm:$0xff] }
  0x25   : > { %p985_p3 = pnand %p984_p2, %p978_p13 }
  0x26   : > { %502 = vperm.xlu0 %973, %v484_v21  }
  0x27   : > { %876 = vmatmul.mubr.msk.f32.gmra.mrb[4].mxu0 %vm332_vm0, %v281_v16  ;;  %507 = vperm.xlu1 %974, %v485_v22  }
  0x28   : > { %878 = vmatprep.mubr.msk.f32.mxu0 %vm332_vm0, %v282_v17 }
  0x2a   : > { %678 = vperm.xlu0 %973, %v668_v23  }
  0x2b   : > { %879 = vmatmul.mubr.msk.f32.gmra.mrb[6].mxu0 %vm332_vm0, %v283_v20  ;;  %683 = vperm.xlu1 %974, %v669_v24  }
  0x2c   : > { %897 = vmatprep.mubr.msk.f32.mxu0 %vm530_vm2, %v474_v36 }
  0x2e   : > { %512 = vperm.xlu0 %973, %v486_v25  }
  0x2f   : > { %688 = vperm.xlu1 %974, %v670_v26  }
  0x32   : > { %517 = vperm.xlu0 %973, %v487_v27  }
  0x33   : > { %693 = vperm.xlu1 %974, %v671_v28  }
  0x36   : > { %522 = vperm.xlu0 %973, %v488_v29  }
  0x37   : > { %698 = vperm.xlu1 %974, %v672_v30  }
  0x3a   : > { %527 = vperm.xlu0 %973, %v489_v31  }
  0x3b   : > { %703 = vperm.xlu1 %974, %v673_v32  }
  0x3e   : > { %708 = vperm.xlu0 %973, %v674_v33  }
  0x3f   : > { %713 = vperm.xlu1 %974, %v675_v34  }
  0x42   : > { %740 = vperm.xlu0 %973, %v737_v35  }
  0x91   : > { %v295_v38 = vpop.permute.xlu0 %294 }
  0x92   : > { %v305_v39 = vpop.permute.xlu1 %304 }
  0x95   : > { %v300_v40 = vpop.permute.xlu0 %299 }
  0x96   : > { %v310_v41 = vpop.permute.xlu1 %309 }
  0x99   : > { %v315_v54 = vpop.permute.xlu0 %314 }
  0x9a   : > { %v320_v51 = vpop.permute.xlu1 %319 }
  0x9d   : > { %v325_v2 = vpop.permute.xlu0 %324 }
  0x9e   : > { %v330_v63 = vpop.permute.xlu1 %329 }
  0xa1   : > { %v493_v16 = vpop.permute.xlu0 %492 }
  0xa2   : > { %v498_v17 = vpop.permute.xlu1 %497 }
  0xa5   : > { %v503_v18 = vpop.permute.xlu0 %502 }
  0xa6   : > { %v508_v19 = vpop.permute.xlu1 %507 }
  0xa9   : > { %v679_v20 = vpop.permute.xlu0 %678 }
  0xaa   : > { %v684_v21 = vpop.permute.xlu1 %683 }
  0xad   : > { %v513_v22 = vpop.permute.xlu0 %512 }
  0xae   : > { %v689_v23 = vpop.permute.xlu1 %688 }
  0xb1   : > { %v518_v24 = vpop.permute.xlu0 %517 }
  0xb2   : > { %v694_v25 = vpop.permute.xlu1 %693 }
  0xb5   : > { %v523_v34 = vpop.permute.xlu0 %522 }
  0xf2   : > { %v871_v42 = vpop.f32.mrb[0].mxu0 }
  0xf3   : > { %v433_v43 = vadd.f32 %v871_v42, %v300_v40  ;;  %v427_v44 = vpop.f32.mrb[1].mxu0 }
  0xf4   : > { %v428_v45 = vadd.f32 %v427_v44, %v295_v38 }
  0xf5   : > { %v467_v46 = vmax.f32 %v433_v43, 0.0 }
  0xf6   : > { %v466_v47 = vmax.f32 %v428_v45, 0.0  ;;  %v874_v48 = vpop.f32.mrb[2].mxu0 }
  0xf7   : > { %v443_v49 = vadd.f32 %v874_v48, %v310_v41  ;;  %v437_v50 = vpop.f32.mrb[3].mxu0 }
  0xf8   : > { %v909_v52 = vpack.c.bf16 %v467_v46, %v466_v47  ;;  %v438_v53 = vadd.f32 %v437_v50, %v305_v39  ;;  %v699_v39 = vpop.permute.xlu1 %698  ;;  %v528_v50 = vpop.permute.xlu0 %527 }
  0xf9   : > { %v469_v55 = vmax.f32 %v443_v49, 0.0 }
  0xfa   : > { %v468_v56 = vmax.f32 %v438_v53, 0.0  ;;  %v877_v57 = vpop.f32.mrb[4].mxu0  ;;  %910 = vmatprep.subr.bf16.mxu0 %v909_v52  ;;  %925 = vmatprep.subr.bf16.mxu1 %v909_v52 }
  0xfb   : > { %v453_v58 = vadd.f32 %v877_v57, %v320_v51  ;;  %v447_v59 = vpop.f32.mrb[5].mxu0  ;;  %912 = vmatpush3.bf16.msra.mxu0 %v909_v52  ;;  %929 = vmatpush3.bf16.msra.mxu1 %v909_v52 }
  0xfc   : > { %v913_v60 = vpack.c.bf16 %v469_v55, %v468_v56  ;;  %v448_v61 = vadd.f32 %v447_v59, %v315_v54  ;;  %v704_v57 = vpop.permute.xlu1 %703 }
  0xfd   : > { %v471_v62 = vmax.f32 %v453_v58, 0.0 }
  0xfe   : > { %v470_v0 = vmax.f32 %v448_v61, 0.0  ;;  %v880_v1 = vpop.f32.mrb[6].mxu0  ;;  %914 = vmatprep.subr.bf16.mxu0 %v913_v60  ;;  %926 = vmatprep.subr.bf16.mxu1 %v913_v60 }
  0xff   : > { %v463_v3 = vadd.f32 %v880_v1, %v330_v63  ;;  %v457_v4 = vpop.f32.mrb[7].mxu0  ;;  %916 = vmatpush3.bf16.msra.mxu0 %v913_v60  ;;  %930 = vmatpush3.bf16.msra.mxu1 %v913_v60 }
 0x100   : > { %v917_v5 = vpack.c.bf16 %v471_v62, %v470_v0  ;;  %v458_v6 = vadd.f32 %v457_v4, %v325_v2  ;;  %v709_v0 = vpop.permute.xlu0 %708 }
 0x101   : > { %v473_v7 = vmax.f32 %v463_v3, 0.0  ;;  %v714_v3 = vpop.permute.xlu1 %713 }
 0x102   : > { %v472_v8 = vmax.f32 %v458_v6, 0.0  ;;  %918 = vmatprep.subr.bf16.mxu0 %v917_v5  ;;  %927 = vmatprep.subr.bf16.mxu1 %v917_v5  ;;  %v743_v6 = vlaneseq }
 0x103   : > { %920 = vmatpush3.bf16.msra.mxu0 %v917_v5  ;;  %931 = vmatpush3.bf16.msra.mxu1 %v917_v5 }
 0x104   : > { %v921_v9 = vpack.c.bf16 %v473_v7, %v472_v8 }
 0x106   : > { %922 = vmatprep.subr.bf16.mxu0 %v921_v9  ;;  %928 = vmatprep.subr.bf16.mxu1 %v921_v9 }
 0x107   : > { %924 = vmatpush3.bf16.msra.mxu0 %v921_v9  ;;  %932 = vmatpush3.bf16.msra.mxu1 %v921_v9  ;;  %v744_v9 = vshrl.u32 %v743_v6, 7 }
 0x10a   : > { %898 = vmatmul.mubr.msk.f32.vlgmr.msra.gmra.mrb[8].mxu0 %vm530_vm2, %v475_v10  ;;  %901 = vmatmul.mubr.msk.f32.vlgmr.msra.gmra.mrb[0].mxu1 %vm530_vm2, %v477_v11 }
 0x10b   : > { %903 = vmatprep.mubr.msk.f32.mxu1 %vm530_vm2, %v478_v12  ;;  %v745_v12 = vsub.s32 0, %v744_v9 }
 0x10e   : > { %904 = vmatmul.mubr.msk.f32.gmra.mrb[2].mxu1 %vm530_vm2, %v479_v13 }
 0x10f   : > { %906 = vmatprep.mubr.msk.f32.mxu1 %vm530_vm2, %v480_v14  ;;  %v741_v14 = vpop.permute.xlu0 %740 }
 0x112   : > { %907 = vmatmul.mubr.msk.f32.gmra.mrb[4].mxu1 %vm530_vm2, %v481_v15 }
 0x1dd   : > { %v899_v26 = vpop.f32.mrb[8].mxu0  ;;  %v902_v27 = vpop.f32.mrb[0].mxu1 }
 0x1de   : > { %v627_v28 = vadd.f32 %v899_v26, %v498_v17  ;;  %v637_v29 = vadd.f32 %v902_v27, %v508_v19  ;;  %v621_v30 = vpop.f32.mrb[9].mxu0  ;;  %v631_v31 = vpop.f32.mrb[1].mxu1 }
 0x1df   : > { %v622_v32 = vadd.f32 %v621_v30, %v493_v16  ;;  %v632_v33 = vadd.f32 %v631_v31, %v503_v18  ;;  %v746_v16 = vrot.slane %v741_v14, %v745_v12 }
 0x1e0   : > { %v661_v35 = vmax.f32 %v627_v28, 0.0  ;;  %v663_v41 = vmax.f32 %v637_v29, 0.0 }
 0x1e1   : > { %v660_v36 = vmax.f32 %v622_v32, 0.0  ;;  %v662_v37 = vmax.f32 %v632_v33, 0.0  ;;  %v905_v38 = vpop.f32.mrb[2].mxu1 }
 0x1e2   : > { %v717_v40 = vmul.f32 %v684_v21, %v661_v35  ;;  %v641_v42 = vpop.f32.mrb[3].mxu1  ;;  %v647_v44 = vadd.f32 %v905_v38, %v518_v24  ;;  %v719_v51 = vmul.f32 %v694_v25, %v663_v41 }
 0x1e3   : > { %v716_v43 = vmul.f32 %v679_v20, %v660_v36  ;;  %v642_v45 = vadd.f32 %v641_v42, %v513_v22  ;;  %v718_v47 = vmul.f32 %v689_v23, %v662_v37 }
 0x1e4   : > { %v665_v54 = vmax.f32 %v647_v44, 0.0 }
 0x1e5   : > { %v724_v46 = vadd.f32 %v717_v40, %v716_v43  ;;  %v664_v48 = vmax.f32 %v642_v45, 0.0  ;;  %v908_v49 = vpop.f32.mrb[4].mxu1 }
 0x1e6   : > { %v651_v52 = vpop.f32.mrb[5].mxu1  ;;  %v657_v55 = vadd.f32 %v908_v49, %v528_v50  ;;  %v721_v61 = vmul.f32 %v704_v57, %v665_v54 }
 0x1e7   : > { %v725_v53 = vadd.f32 %v724_v46, %v718_v47  ;;  %v652_v56 = vadd.f32 %v651_v52, %v523_v34  ;;  %v720_v58 = vmul.f32 %v699_v39, %v664_v48 }
 0x1e8   : > { %v667_v63 = vmax.f32 %v657_v55, 0.0 }
 0x1e9   : > { %v726_v59 = vadd.f32 %v725_v53, %v719_v51  ;;  %v666_v60 = vmax.f32 %v652_v56, 0.0 }
 0x1ea   : > { %v723_v4 = vmul.f32 %v714_v3, %v667_v63 }
 0x1eb   : > { %v727_v62 = vadd.f32 %v726_v59, %v720_v58  ;;  %v722_v1 = vmul.f32 %v709_v0, %v666_v60 }
 0x1ed   : > { %v728_v2 = vadd.f32 %v727_v62, %v721_v61 }
 0x1ef   : > { %v729_v5 = vadd.f32 %v728_v2, %v722_v1 }
 0x1f1   : > { %v730_v7 = vadd.f32 %v729_v5, %v723_v4 }
 0x1f3   : > { %v731_v8 = vrot.slane %v730_v7, 4 }
 0x1f5   : > { %v732_v10 = vadd.f32 %v731_v8, %v730_v7 }
 0x1f7   : > { %v733_v11 = vrot.slane %v732_v10, 2 }
 0x1f9   : > { %v734_v13 = vadd.f32 %v733_v11, %v732_v10 }
 0x1fb   : > { %v735_v15 = vrot.slane %v734_v13, 1 }
 0x1fd   : > { %v736_v17 = vadd.f32 %v735_v15, %v734_v13 }
 0x1ff   : > { %v747_v18 = vadd.f32 %v746_v16, %v736_v17 }
 0x201   : > { %748 = vst [vmem:[%s270_s30] sm:$0x1] %v747_v18 }
 0x202   : > { %988 = shalt.err (!%p985_p3)
}
 0x203   : > { %s989_s20 = scalar_lea.hbm %s1278_s15, 16  ;;  %s993_s23 = scalar_lea.hbm %s1327_s7, 32 }
 0x204   : > { %p990_p4 = scmp.ne.s32.totalorder %s1278_s15, %s989_s20  ;;  %p994_p9 = scmp.lt.u32.totalorder %s1278_s15, %s1327_s7 }
 0x205   : > { %p995_p10 = scmp.lt.u32.totalorder %s993_s23, %s989_s20  ;;  %p997_p12 = scmp.lt.u32.totalorder %s989_s20, %s1278_s15 }
 0x206   : > { %p991_p7 = pnand %p990_p4, %p1122_p5 }
 0x207   : > { %p996_p11 = por %p995_p10, %p994_p9 }
 0x208   : > { %p992_p8 = pneg %p991_p7 }
 0x209   : > { %p998_p13 = por %p997_p12, %p996_p11 }
 0x20b   : > { %p999_p0 = pnand %p998_p13, %p992_p8 }
 0x20d   : > { %1002 = shalt.err (!%p999_p0)
}
 0x20e   : > { %933 = dma.vmem_to_hbm [thread:$0]  (%p1122_p5), %s1280_s9, 16, %s1278_s15, %s750_s16  }
 0x20f PF: > { %p939_p1 = scmp.ge.s32.totalorder %s1037_s29, 2  ;;  %s774_s30 = sand.u32 1, %s1025_s26  }
 0x210   : > { %s775_s10 = scalar_lea.sflag [#allocation4], %s774_s30 }
 0x211   : > { %p936_p2 = pnand %p939_p1, %p1126_p6 }
 0x213   : > { %1020 = dma.done.wait (!%p936_p2), %s775_s10, 16  }
 0x214   : > { %1022 = vsyncadd (!%p936_p2), %s775_s10, 4294967280  ;;  %p19_p3 = scmp.ge.s32.totalorder %s1109_s8, 4   ;;  %s1330_s26 = smov %s1029_s27 }
 0x215   : > { %s1331_s27 = smov %s1033_s28  ;;  %s1332_s28 = smov %s1120_s11 }
 0x216   : > { %s1333_s29 = smov %s1109_s8  ;;  %21 = sbr.rel (!%p19_p3) target bundleno = 6 (0x6), region = 83 }
 0x21d   :  { %779 = vsyncpa [#allocation4], 1 }
 0x21e   :  { %781 = vsyncpa [#allocation4 + $0x1], 1 }

</bundles_post_ra>
